<compile_context>
chip_gen: v6e
topology: v6e:2x2x1
jax: 0.10.0
libtpu: 0.0.40
codegen_flags: <defaults>
</compile_context>

<pallas_src>
import jax
import jax.numpy as jnp
from jax.experimental import pallas as pl
from jax.experimental.pallas import tpu as pltpu

LOG_STD_MAX = 2.0
LOG_STD_MIN = -20.0

_LANE = 128


def _round_up(x, m):
    return ((x + m - 1) // m) * m


# ----------------------------------------------------------------------------
# Kernel
# ----------------------------------------------------------------------------
def actor_kernel(s_ref, w1_ref, b1_ref, w2_ref, b2_ref, wh_ref, bh_ref, out_ref):
    """One batch tile of the Actor MLP.

    s_ref : [TB, Sp] bf16 (zero-padded state tile)
    w*    : bf16 weights [in_pad, out_pad]; b* : f32 [1, out_pad]
    wh/bh : fused mu|log_std head, out width 2*Ap (each head padded to 128)
    out   : [TB, 2*Ap] f32; cols [0, Ap) = mu, cols [Ap, 2*Ap) = clamped log_std
    """
    x = s_ref[...]                                                  # bf16

    # Layer 1: bf16 MXU matmul, f32 accumulate; bias/ReLU in f32.
    h1 = jnp.dot(x, w1_ref[...], preferred_element_type=jnp.float32) + b1_ref[...]
    h1 = jnp.maximum(h1, 0.0)

    # Layer 2.
    h2 = jnp.dot(h1.astype(jnp.bfloat16), w2_ref[...],
                 preferred_element_type=jnp.float32) + b2_ref[...]
    h2 = jnp.maximum(h2, 0.0)

    # Fused heads: single matmul produces [mu | log_std] lane-densely.
    head = jnp.dot(h2.astype(jnp.bfloat16), wh_ref[...],
                   preferred_element_type=jnp.float32) + bh_ref[...]

    half = head.shape[1] // 2
    col = jax.lax.broadcasted_iota(jnp.int32, head.shape, 1)
    clipped = jnp.clip(head, LOG_STD_MIN, LOG_STD_MAX)
    # Clamp only the log_std half; one full-width, lane-dense store.
    out_ref[...] = jnp.where(col >= half, clipped, head)


# ----------------------------------------------------------------------------
# Param init (matches PyTorch weights_init_) and packing for the kernel
# ----------------------------------------------------------------------------
def init_actor_params(key, state_dim, action_dim, hidden_dim):
    """uniform(-0.003, 0.003) for all weights and biases, like weights_init_."""
    ks = jax.random.split(key, 8)
    u = lambda k, shape: jax.random.uniform(
        k, shape, dtype=jnp.float32, minval=-0.003, maxval=0.003)
    return {
        "w1":   u(ks[0], (state_dim, hidden_dim)),
        "b1":   u(ks[1], (1, hidden_dim)),
        "w2":   u(ks[2], (hidden_dim, hidden_dim)),
        "b2":   u(ks[3], (1, hidden_dim)),
        "w_mu": u(ks[4], (hidden_dim, action_dim)),
        "b_mu": u(ks[5], (1, action_dim)),
        "w_ls": u(ks[6], (hidden_dim, action_dim)),
        "b_ls": u(ks[7], (1, action_dim)),
    }


def pack_actor_params(params):
    """Pad dims to 128 lanes, fuse the two heads, cast weights to bf16.

    Do this ONCE (outside the RL step loop) so weights are not re-packed per call.
    """
    S, H = params["w1"].shape
    A = params["w_mu"].shape[1]
    Sp, Hp, Ap = _round_up(S, _LANE), _round_up(H, _LANE), _round_up(A, _LANE)

    def pad2(x, r, c):
        return jnp.pad(x, ((0, r - x.shape[0]), (0, c - x.shape[1])))

    w_head = jnp.concatenate(
        [pad2(params["w_mu"], Hp, Ap), pad2(params["w_ls"], Hp, Ap)], axis=1)
    b_head = jnp.concatenate(
        [pad2(params["b_mu"], 1, Ap), pad2(params["b_ls"], 1, Ap)], axis=1)

    return {
        "w1": pad2(params["w1"], Sp, Hp).astype(jnp.bfloat16),
        "b1": pad2(params["b1"], 1, Hp).astype(jnp.float32),
        "w2": pad2(params["w2"], Hp, Hp).astype(jnp.bfloat16),
        "b2": pad2(params["b2"], 1, Hp).astype(jnp.float32),
        "w_head": w_head.astype(jnp.bfloat16),
        "b_head": b_head.astype(jnp.float32),
        "dims": (S, H, A, Sp, Hp, Ap),   # static python ints
    }


# ----------------------------------------------------------------------------
# Wrapper
# ----------------------------------------------------------------------------
def actor_forward(state, packed, *, block_b=256):
    """state: [B, state_dim] f32. Returns (mu, log_std) each [B, action_dim] f32."""
    S, H, A, Sp, Hp, Ap = packed["dims"]
    B = state.shape[0]

    # Batch tile: multiple of 16 (bf16 sublane packing), capped at block_b.
    TB = min(block_b, _round_up(B, 16))
    Bp = _round_up(B, TB)

    x = jnp.pad(state.astype(jnp.float32),
                ((0, Bp - B), (0, Sp - S))).astype(jnp.bfloat16)

    vmem = pltpu.MemorySpace.VMEM
    grid_spec = pltpu.PrefetchScalarGridSpec(
        num_scalar_prefetch=0,
        grid=(pl.cdiv(Bp, TB),),
        in_specs=[
            pl.BlockSpec((TB, Sp), lambda i: (i, 0), memory_space=vmem),   # state tile
            pl.BlockSpec((Sp, Hp), lambda i: (0, 0), memory_space=vmem),   # w1 (resident)
            pl.BlockSpec((1, Hp), lambda i: (0, 0), memory_space=vmem),    # b1
            pl.BlockSpec((Hp, Hp), lambda i: (0, 0), memory_space=vmem),   # w2
            pl.BlockSpec((1, Hp), lambda i: (0, 0), memory_space=vmem),    # b2
            pl.BlockSpec((Hp, 2 * Ap), lambda i: (0, 0), memory_space=vmem),  # fused head W
            pl.BlockSpec((1, 2 * Ap), lambda i: (0, 0), memory_space=vmem),   # fused head b
        ],
        out_specs=pl.BlockSpec((TB, 2 * Ap), lambda i: (i, 0), memory_space=vmem),
    )

    out = pl.pallas_call(
        actor_kernel,
        out_shape=jax.ShapeDtypeStruct((Bp, 2 * Ap), jnp.float32),
        grid_spec=grid_spec,
        compiler_params=pltpu.CompilerParams(
            dimension_semantics=("parallel",)),
    )(x, packed["w1"], packed["b1"], packed["w2"], packed["b2"],
      packed["w_head"], packed["b_head"])

    mu = out[:B, :A]
    log_std = out[:B, Ap:Ap + A]
    return mu, log_std


def actor_forward_ref(state, params):
    """Pure-JAX f32 reference matching the PyTorch module."""
    h1 = jnp.maximum(state @ params["w1"] + params["b1"], 0.0)
    h2 = jnp.maximum(h1 @ params["w2"] + params["b2"], 0.0)
    mu = h2 @ params["w_mu"] + params["b_mu"]
    ls = jnp.clip(h2 @ params["w_ls"] + params["b_ls"], LOG_STD_MIN, LOG_STD_MAX)
    return mu, ls


# TODO(synk): Actor.sample() (Normal.rsample + tanh-squash log-prob) is host-side
# distribution logic and is intentionally not implemented as a Pallas kernel.

if __name__ == "__main__":
    key = jax.random.PRNGKey(0)
    k_param, k_state = jax.random.split(key)

    batch = 2
    state_dim = 16
    action_dim = 4
    hidden_dim = 32

    params = init_actor_params(k_param, state_dim, action_dim, hidden_dim)
    packed = pack_actor_params(params)   # hoist packing out of the call loop
    state = jax.random.normal(k_state, (batch, state_dim), dtype=jnp.float32)

    mu, log_std = actor_forward(state, packed)
    mu = jax.block_until_ready(mu)
    log_std = jax.block_until_ready(log_std)

    # Validate against pure-JAX f32 reference (bf16 matmul inputs -> relaxed tol).
    mu_ref, ls_ref = actor_forward_ref(state, params)
    assert mu.shape == (batch, action_dim)
    assert log_std.shape == (batch, action_dim)
    assert jnp.allclose(mu, mu_ref, atol=2e-3, rtol=2e-2), (mu, mu_ref)
    assert jnp.allclose(log_std, ls_ref, atol=2e-3, rtol=2e-2), (log_std, ls_ref)
    assert bool(jnp.all(log_std <= LOG_STD_MAX)) and bool(jnp.all(log_std >= LOG_STD_MIN))

    print("KERNEL_OK")
</pallas_src>

<mosaic_0001>
module attributes {stable_mosaic.version = 11 : i64} {
  func.func @actor_kernel(%arg0: i32, %arg1: memref<16x128xbf16, #tpu.memory_space<vmem>>, %arg2: memref<128x128xbf16, #tpu.memory_space<vmem>>, %arg3: memref<1x128xf32, #tpu.memory_space<vmem>>, %arg4: memref<128x128xbf16, #tpu.memory_space<vmem>>, %arg5: memref<1x128xf32, #tpu.memory_space<vmem>>, %arg6: memref<128x256xbf16, #tpu.memory_space<vmem>>, %arg7: memref<1x256xf32, #tpu.memory_space<vmem>>, %arg8: memref<16x256xf32, #tpu.memory_space<vmem>>) attributes {dimension_semantics = [#tpu.dimension_semantics<parallel>], iteration_bounds = array<i64: 1>, scalar_prefetch = 0 : i64, scratch_operands = 0 : i64, tpu.core_type = #tpu.core_type<tc>, window_params = [{transform_indices = @transform_0, window_bounds = array<i64: 16, 128>}, {pipeline_mode = #tpu.pipeline_mode<synchronous>, transform_indices = @transform_1, window_bounds = array<i64: 128, 128>}, {pipeline_mode = #tpu.pipeline_mode<synchronous>, transform_indices = @transform_2, window_bounds = array<i64: 1, 128>}, {pipeline_mode = #tpu.pipeline_mode<synchronous>, transform_indices = @transform_3, window_bounds = array<i64: 128, 128>}, {pipeline_mode = #tpu.pipeline_mode<synchronous>, transform_indices = @transform_4, window_bounds = array<i64: 1, 128>}, {pipeline_mode = #tpu.pipeline_mode<synchronous>, transform_indices = @transform_5, window_bounds = array<i64: 128, 256>}, {pipeline_mode = #tpu.pipeline_mode<synchronous>, transform_indices = @transform_6, window_bounds = array<i64: 1, 256>}, {transform_indices = @transform_7, window_bounds = array<i64: 16, 256>}]} {
    %c0 = arith.constant 0 : index
    %c0_0 = arith.constant 0 : index
    %0 = vector.load %arg1[%c0, %c0_0] : memref<16x128xbf16, #tpu.memory_space<vmem>>, vector<16x128xbf16>
    %c0_1 = arith.constant 0 : index
    %c0_2 = arith.constant 0 : index
    %1 = vector.load %arg2[%c0_1, %c0_2] : memref<128x128xbf16, #tpu.memory_space<vmem>>, vector<128x128xbf16>
    %cst = arith.constant dense<0.000000e+00> : vector<16x128xf32>
    %2 = tpu.matmul %0, %1, %cst {dimension_numbers = #tpu.dot_dimension_numbers<[1], [0], [0], [1], [0, 0, 1, 1], [], []>} : vector<16x128xbf16>, vector<128x128xbf16>, vector<16x128xf32> -> vector<16x128xf32>
    %c0_3 = arith.constant 0 : index
    %c0_4 = arith.constant 0 : index
    %3 = vector.load %arg3[%c0_3, %c0_4] : memref<1x128xf32, #tpu.memory_space<vmem>>, vector<1x128xf32>
    %4 = vector.broadcast %3 : vector<1x128xf32> to vector<16x128xf32>
    %5 = arith.addf %2, %4 : vector<16x128xf32>
    %cst_5 = arith.constant 0.000000e+00 : f32
    %6 = vector.broadcast %cst_5 : f32 to vector<16x128xf32>
    %7 = arith.maximumf %5, %6 : vector<16x128xf32>
    %8 = arith.truncf %7 : vector<16x128xf32> to vector<16x128xbf16>
    %c0_6 = arith.constant 0 : index
    %c0_7 = arith.constant 0 : index
    %9 = vector.load %arg4[%c0_6, %c0_7] : memref<128x128xbf16, #tpu.memory_space<vmem>>, vector<128x128xbf16>
    %cst_8 = arith.constant dense<0.000000e+00> : vector<16x128xf32>
    %10 = tpu.matmul %8, %9, %cst_8 {dimension_numbers = #tpu.dot_dimension_numbers<[1], [0], [0], [1], [0, 0, 1, 1], [], []>} : vector<16x128xbf16>, vector<128x128xbf16>, vector<16x128xf32> -> vector<16x128xf32>
    %c0_9 = arith.constant 0 : index
    %c0_10 = arith.constant 0 : index
    %11 = vector.load %arg5[%c0_9, %c0_10] : memref<1x128xf32, #tpu.memory_space<vmem>>, vector<1x128xf32>
    %12 = vector.broadcast %11 : vector<1x128xf32> to vector<16x128xf32>
    %13 = arith.addf %10, %12 : vector<16x128xf32>
    %cst_11 = arith.constant 0.000000e+00 : f32
    %14 = vector.broadcast %cst_11 : f32 to vector<16x128xf32>
    %15 = arith.maximumf %13, %14 : vector<16x128xf32>
    %16 = arith.truncf %15 : vector<16x128xf32> to vector<16x128xbf16>
    %c0_12 = arith.constant 0 : index
    %c0_13 = arith.constant 0 : index
    %17 = vector.load %arg6[%c0_12, %c0_13] : memref<128x256xbf16, #tpu.memory_space<vmem>>, vector<128x256xbf16>
    %cst_14 = arith.constant dense<0.000000e+00> : vector<16x256xf32>
    %18 = tpu.matmul %16, %17, %cst_14 {dimension_numbers = #tpu.dot_dimension_numbers<[1], [0], [0], [1], [0, 0, 1, 1], [], []>} : vector<16x128xbf16>, vector<128x256xbf16>, vector<16x256xf32> -> vector<16x256xf32>
    %c0_15 = arith.constant 0 : index
    %c0_16 = arith.constant 0 : index
    %19 = vector.load %arg7[%c0_15, %c0_16] : memref<1x256xf32, #tpu.memory_space<vmem>>, vector<1x256xf32>
    %20 = vector.broadcast %19 : vector<1x256xf32> to vector<16x256xf32>
    %21 = arith.addf %18, %20 : vector<16x256xf32>
    %22 = tpu.iota {dimensions = array<i32: 1>} : vector<16x256xi32>
    %cst_17 = arith.constant -2.000000e+01 : f32
    %cst_18 = arith.constant 2.000000e+00 : f32
    %23 = vector.broadcast %cst_17 : f32 to vector<16x256xf32>
    %24 = arith.maximumf %23, %21 : vector<16x256xf32>
    %25 = vector.broadcast %cst_18 : f32 to vector<16x256xf32>
    %26 = arith.minimumf %25, %24 : vector<16x256xf32>
    %c128_i32 = arith.constant 128 : i32
    %27 = vector.broadcast %c128_i32 : i32 to vector<16x256xi32>
    %28 = arith.cmpi sge, %22, %27 : vector<16x256xi32>
    %29 = arith.select %28, %26, %21 : vector<16x256xi1>, vector<16x256xf32>
    %c0_19 = arith.constant 0 : index
    %c0_20 = arith.constant 0 : index
    %30 = vector.load %arg8[%c0_19, %c0_20] : memref<16x256xf32, #tpu.memory_space<vmem>>, vector<16x256xf32>
    tpu.vector_store %arg8[%c0_19, %c0_20], %29 {strides = array<i32>} : memref<16x256xf32, #tpu.memory_space<vmem>>, vector<16x256xf32>,
    return
  }
  func.func @transform_0(%arg0: i32) -> (i32, i32) {
    %c0_i32 = arith.constant 0 : i32
    %c0_i32_0 = arith.constant 0 : i32
    return %arg0, %c0_i32 : i32, i32
  }
  func.func @transform_1(%arg0: i32) -> (i32, i32) {
    %c0_i32 = arith.constant 0 : i32
    %c0_i32_0 = arith.constant 0 : i32
    %c0_i32_1 = arith.constant 0 : i32
    return %c0_i32, %c0_i32_0 : i32, i32
  }
  func.func @transform_2(%arg0: i32) -> (i32, i32) {
    %c0_i32 = arith.constant 0 : i32
    %c0_i32_0 = arith.constant 0 : i32
    %c0_i32_1 = arith.constant 0 : i32
    return %c0_i32, %c0_i32_0 : i32, i32
  }
  func.func @transform_3(%arg0: i32) -> (i32, i32) {
    %c0_i32 = arith.constant 0 : i32
    %c0_i32_0 = arith.constant 0 : i32
    %c0_i32_1 = arith.constant 0 : i32
    return %c0_i32, %c0_i32_0 : i32, i32
  }
  func.func @transform_4(%arg0: i32) -> (i32, i32) {
    %c0_i32 = arith.constant 0 : i32
    %c0_i32_0 = arith.constant 0 : i32
    %c0_i32_1 = arith.constant 0 : i32
    return %c0_i32, %c0_i32_0 : i32, i32
  }
  func.func @transform_5(%arg0: i32) -> (i32, i32) {
    %c0_i32 = arith.constant 0 : i32
    %c0_i32_0 = arith.constant 0 : i32
    %c0_i32_1 = arith.constant 0 : i32
    return %c0_i32, %c0_i32_0 : i32, i32
  }
  func.func @transform_6(%arg0: i32) -> (i32, i32) {
    %c0_i32 = arith.constant 0 : i32
    %c0_i32_0 = arith.constant 0 : i32
    %c0_i32_1 = arith.constant 0 : i32
    return %c0_i32, %c0_i32_0 : i32, i32
  }
  func.func @transform_7(%arg0: i32) -> (i32, i32) {
    %c0_i32 = arith.constant 0 : i32
    %c0_i32_0 = arith.constant 0 : i32
    return %arg0, %c0_i32 : i32, i32
  }
}

</mosaic_0001>

<bundles_post_ra>
// kernel: tpu_custom_call.1
= control target key start
LH: loop header
LB: loop body
LE: loop exit
PB: predicated region body
PF: predicated region fallthrough
CT: control target
= control target key end

     0   :  { %12 = vsyncpa [#allocation3], 0  ;;  %s846_s0 = inlined_call_operand.hbm [shape: bf16[16,128], index: 0, kind: input, shape index: {}]   ;;  %s847_s1 = inlined_call_operand.hbm [shape: bf16[128,128], index: 1, kind: input, shape index: {}]   ;;  %s848_s2 = inlined_call_operand.vmem [shape: f32[1,128], index: 2, kind: input, shape index: {}]   ;;  %s849_s3 = inlined_call_operand.hbm [shape: bf16[128,128], index: 3, kind: input, shape index: {}]   ;;  %s850_s4 = inlined_call_operand.vmem [shape: f32[1,128], index: 4, kind: input, shape index: {}]   ;;  %s851_s5 = inlined_call_operand.hbm [shape: bf16[128,256], index: 5, kind: input, shape index: {}]   ;;  %s852_s6 = inlined_call_operand.vmem [shape: f32[1,256], index: 6, kind: input, shape index: {}]   ;;  %s853_s7 = inlined_call_operand.hbm [shape: f32[16,256], index: 7, kind: output, shape index: {}]  }
   0x1   :  { %13 = vsyncpa [#allocation6], 0 }
   0x2   :  { %14 = vsyncpa [#allocation9], 0 }
   0x3   :  { %15 = vsyncpa [#allocation4], 0  ;;  %s768_s24 = smov [#allocation5]   ;;  %s769_s26 = smov [#allocation2]  }
   0x4   :  { %s33_s25 = sshll.u32 %s768_s24, 4  ;;  %s21_s27 = sshll.u32 %s769_s26, 4  ;;  %s34_s25 = int_to_ptr.vmem [resolvable:$true] %s33_s25  ;;  %s22_s27 = int_to_ptr.vmem [resolvable:$true] %s21_s27 }
   0x5   :  { %s668_s28 = scalar_lea.vmem %s34_s25, 1024  ;;  %p673_p1 = scmp.lt.s32.totalorder %s34_s25, %s34_s25 }
   0x6   :  { %p669_p0 = scmp.ne.s32.totalorder %s34_s25, %s668_s28  ;;  %p674_p2 = scmp.lt.s32.totalorder %s668_s28, %s668_s28 }
   0x8   :  { %p675_p3 = por %p674_p2, %p673_p1 }
   0xa   :  { %p676_p4 = pnand %p675_p3, %p669_p0 }
   0xc   :  { %679 = shalt.err (!%p676_p4)
}
   0xd   :  { %s770_s29 = smov 64   ;;  %s771_s30 = smov 4  }
   0xe   :  { %39 = dma.hbm_to_vmem [thread:$0]  %s847_s1, 1024, %s34_s25, [#allocation6], %s770_s29, %s770_s29, %s771_s30  }
   0xf   :  { %s688_s10 = scalar_lea.vmem %s22_s27, 128  ;;  %p693_p6 = scmp.lt.s32.totalorder %s22_s27, %s22_s27 }
  0x10   :  { %p689_p5 = scmp.ne.s32.totalorder %s22_s27, %s688_s10  ;;  %p694_p7 = scmp.lt.s32.totalorder %s688_s10, %s688_s10 }
  0x12   :  { %p695_p8 = por %p694_p7, %p693_p6 }
  0x14   :  { %p696_p9 = pnand %p695_p8, %p689_p5 }
  0x16   :  { %699 = shalt.err (!%p696_p9)
}
  0x17   :  { %27 = dma.hbm_to_vmem [thread:$0]  %s846_s0, 128, %s22_s27, [#allocation3], %s770_s29, %s770_s29, %s771_s30  }
  0x18   :  { %s772_s13 = smov [#allocation7]   ;;  %s773_s15 = smov [#allocation8]  }
  0x19   :  { %s47_s14 = sshll.u32 %s772_s13, 4  ;;  %s61_s16 = sshll.u32 %s773_s15, 4  ;;  %s48_s14 = int_to_ptr.vmem [resolvable:$true] %s47_s14  ;;  %s62_s16 = int_to_ptr.vmem [resolvable:$true] %s61_s16 }
  0x1a   :  { %s708_s17 = scalar_lea.vmem %s48_s14, 1024  ;;  %p713_p11 = scmp.lt.s32.totalorder %s48_s14, %s48_s14 }
  0x1b   :  { %p709_p10 = scmp.ne.s32.totalorder %s48_s14, %s708_s17  ;;  %p714_p12 = scmp.lt.s32.totalorder %s708_s17, %s708_s17 }
  0x1d   :  { %p715_p13 = por %p714_p12, %p713_p11 }
  0x1f   :  { %p716_p0 = pnand %p715_p13, %p709_p10 }
  0x21   :  { %719 = shalt.err (!%p716_p0)
}
  0x22   :  { %53 = dma.hbm_to_vmem [thread:$0]  %s849_s3, 1024, %s48_s14, [#allocation6], %s770_s29, %s770_s29, %s771_s30  }
  0x23   :  { %s728_s19 = scalar_lea.vmem %s62_s16, 2048  ;;  %p733_p2 = scmp.lt.s32.totalorder %s62_s16, %s62_s16 }
  0x24   :  { %p729_p1 = scmp.ne.s32.totalorder %s62_s16, %s728_s19  ;;  %p734_p3 = scmp.lt.s32.totalorder %s728_s19, %s728_s19 }
  0x26   :  { %p735_p4 = por %p734_p3, %p733_p2 }
  0x28   :  { %p736_p5 = pnand %p735_p4, %p729_p1 }
  0x2a   :  { %739 = shalt.err (!%p736_p5)
}
  0x2b   :  { %s774_s0 = smov 128   ;;  %s775_s20 = smov 8  }
  0x2c   :  { %67 = dma.hbm_to_vmem [thread:$0]  %s851_s5, 2048, %s62_s16, [#allocation9], %s774_s0, %s774_s0, %s775_s20  }
  0x2d   :  { %760 = dma.done.wait [#allocation3], 128  }
  0x2e   :  { %761 = vsyncadd [#allocation3], 4294967168 }
  0x2f   :  { %762 = dma.done.wait [#allocation6], 2048  }
  0x30   :  { %763 = vsyncadd [#allocation6], 4294965248 }
  0x31   :  { %764 = dma.done.wait [#allocation9], 2048  }
  0x32   :  { %765 = vsyncadd [#allocation9], 4294965248  ;;  %v776_v0 = vmov 0.0   ;;  %vm777_vm0 = vmmov 0   ;;  %v619_v1 = vld [vmem:[#allocation5 + $0x38] sm:$0xff]   ;;  %v620_v2 = vld [vmem:[#allocation5 + $0x30] sm:$0xff]   ;;  %v339_v55 = vlaneseq }
  0x33   :  { %565 = vmatprep.subr.bf16.mxu0 %v776_v0  ;;  %581 = vmatprep.mubr.msk.bf16.mxu0 %vm777_vm0, %v776_v0  ;;  %v621_v3 = vld [vmem:[#allocation5 + $0x28] sm:$0xff]   ;;  %v628_v4 = vld [vmem:[#allocation7 + $0x38] sm:$0xff]   ;;  %v622_v5 = vld [vmem:[#allocation5 + $0x20] sm:$0xff]   ;;  %v778_v44 = vmov 0  }
  0x34   :  { %585 = vmatprep.subr.bf16.mxu1 %v776_v0  ;;  %601 = vmatprep.mubr.msk.bf16.mxu1 %vm777_vm0, %v776_v0  ;;  %v629_v6 = vld [vmem:[#allocation7 + $0x30] sm:$0xff]   ;;  %v623_v7 = vld [vmem:[#allocation5 + $0x18] sm:$0xff]   ;;  %v630_v8 = vld [vmem:[#allocation7 + $0x28] sm:$0xff]   ;;  %v340_v56 = vshrl.u32 %v339_v55, 7 }
  0x35   :  { %566 = vmatpush3.bf16.msra.mxu0 %v619_v1  ;;  %586 = vmatpush3.bf16.msra.mxu1 %v628_v4  ;;  %v624_v9 = vld [vmem:[#allocation5 + $0x10] sm:$0xff]   ;;  %v631_v10 = vld [vmem:[#allocation7 + $0x20] sm:$0xff]   ;;  %v625_v11 = vld [vmem:[#allocation5 + $0x8] sm:$0xff]  }
  0x36   :  { %567 = vmatprep.subr.bf16.mxu0 %v776_v0  ;;  %587 = vmatprep.subr.bf16.mxu1 %v776_v0  ;;  %v632_v12 = vld [vmem:[#allocation7 + $0x18] sm:$0xff]   ;;  %v626_v13 = vld [vmem:[#allocation5] sm:$0xff]   ;;  %v633_v15 = vld [vmem:[#allocation7 + $0x10] sm:$0xff]   ;;  %v341_v57 = vsub.s32 0, %v340_v56  ;;  %v345_v59 = vsub.s32 1, %v340_v56 }
  0x37   :  { %v627_v14 = vld [vmem:[#allocation2] sm:$0xff]   ;;  %v634_v16 = vld [vmem:[#allocation7 + $0x8] sm:$0xff]   ;;  %v635_v17 = vld [vmem:[#allocation7] sm:$0xff]  }
  0x38   :  { %v636_v18 = vld [vmem:[#allocation8 + $0x70] ss:$8 sps:$4 sm:$0xff]   ;;  %v638_v19 = vld [vmem:[#allocation8 + $0x74] ss:$8 sps:$4 sm:$0xff]   ;;  %v641_v20 = vld [vmem:[#allocation8 + $0x64] ss:$8 sps:$4 sm:$0xff]  }
  0x39   :  { %568 = vmatpush3.bf16.msra.mxu0 %v620_v2  ;;  %588 = vmatpush3.bf16.msra.mxu1 %v629_v6  ;;  %v639_v21 = vld [vmem:[#allocation8 + $0x60] ss:$8 sps:$4 sm:$0xff]   ;;  %v644_v22 = vld [vmem:[#allocation8 + $0x54] ss:$8 sps:$4 sm:$0xff]   ;;  %v642_v23 = vld [vmem:[#allocation8 + $0x50] ss:$8 sps:$4 sm:$0xff]  }
  0x3a   :  { %569 = vmatprep.subr.bf16.mxu0 %v776_v0  ;;  %589 = vmatprep.subr.bf16.mxu1 %v776_v0  ;;  %v647_v24 = vld [vmem:[#allocation8 + $0x44] ss:$8 sps:$4 sm:$0xff]   ;;  %v645_v25 = vld [vmem:[#allocation8 + $0x40] ss:$8 sps:$4 sm:$0xff]   ;;  %v650_v26 = vld [vmem:[#allocation8 + $0x34] ss:$8 sps:$4 sm:$0xff]  }
  0x3b   :  { %v648_v27 = vld [vmem:[#allocation8 + $0x30] ss:$8 sps:$4 sm:$0xff]   ;;  %v653_v28 = vld [vmem:[#allocation8 + $0x24] ss:$8 sps:$4 sm:$0xff]   ;;  %v651_v29 = vld [vmem:[#allocation8 + $0x20] ss:$8 sps:$4 sm:$0xff]  }
  0x3c   :  { %v512_v30 = vld [vmem:[%s848_s2] ss:$0 sm:$0xff]  ;;  %v656_v40 = vld [vmem:[#allocation8 + $0x14] ss:$8 sps:$4 sm:$0xff]   ;;  %v659_v42 = vld [vmem:[#allocation8 + $0x4] ss:$8 sps:$4 sm:$0xff]  }
  0x3d   :  { %570 = vmatpush3.bf16.msra.mxu0 %v621_v3  ;;  %590 = vmatpush3.bf16.msra.mxu1 %v630_v8  ;;  %v654_v41 = vld [vmem:[#allocation8 + $0x10] ss:$8 sps:$4 sm:$0xff]   ;;  %v657_v43 = vld [vmem:[#allocation8] ss:$8 sps:$4 sm:$0xff]  }
  0x3e   :  { %571 = vmatprep.subr.bf16.mxu0 %v776_v0  ;;  %591 = vmatprep.subr.bf16.mxu1 %v776_v0  ;;  %v522_v45 = vld [vmem:[%s850_s4] ss:$0 sm:$0xff]  ;;  %s779_s4 = smov [#allocation10]  }
  0x3f   :  { %v337_v58 = vld [vmem:[%s852_s6] sm:$0x3]  ;;  %s498_s26 = sshll.u32 %s779_s4, 4  ;;  %s499_s26 = int_to_ptr.vmem [resolvable:$true] %s498_s26 }
  0x40   :  { %v342_v60 = vrot.slane %v337_v58, %v341_v57  ;;  %v346_v61 = vrot.slane %v337_v58, %v345_v59  ;;  %s740_s6 = scalar_lea.vmem %s499_s26, 512  ;;  %p745_p7 = scmp.lt.s32.totalorder %s499_s26, %s499_s26 }
  0x41   :  { %572 = vmatpush3.bf16.msra.mxu0 %v622_v5  ;;  %592 = vmatpush3.bf16.msra.mxu1 %v631_v10  ;;  %p741_p6 = scmp.ne.s32.totalorder %s499_s26, %s740_s6  ;;  %p746_p8 = scmp.lt.s32.totalorder %s740_s6, %s740_s6 }
  0x42   :  { %573 = vmatprep.subr.bf16.mxu0 %v776_v0  ;;  %593 = vmatprep.subr.bf16.mxu1 %v776_v0 }
  0x43   :  { %p747_p9 = por %p746_p8, %p745_p7 }
  0x45   :  { %574 = vmatpush3.bf16.msra.mxu0 %v623_v7  ;;  %594 = vmatpush3.bf16.msra.mxu1 %v632_v12  ;;  %p748_p10 = pnand %p747_p9, %p741_p6 }
  0x46   :  { %575 = vmatprep.subr.bf16.mxu0 %v776_v0  ;;  %595 = vmatprep.subr.bf16.mxu1 %v776_v0 }
  0x49   :  { %576 = vmatpush3.bf16.msra.mxu0 %v624_v9  ;;  %596 = vmatpush3.bf16.msra.mxu1 %v633_v15 }
  0x4a   :  { %577 = vmatprep.subr.bf16.mxu0 %v776_v0  ;;  %597 = vmatprep.subr.bf16.mxu1 %v776_v0 }
  0x4d   :  { %578 = vmatpush3.bf16.msra.mxu0 %v625_v11  ;;  %598 = vmatpush3.bf16.msra.mxu1 %v634_v16 }
  0x4e   :  { %579 = vmatprep.subr.bf16.mxu0 %v776_v0  ;;  %599 = vmatprep.subr.bf16.mxu1 %v776_v0 }
  0x51   :  { %580 = vmatpush3.bf16.msra.mxu0 %v626_v13  ;;  %600 = vmatpush3.bf16.msra.mxu1 %v635_v17 }
  0x52   :  { %429 = vmatprep.subr.bf16.mxu0 %v638_v19 }
  0x54   :  { %582 = vmatmul.mubr.bf16.vlgmr.msra.gmra.mxu0 %v627_v14 }
  0x55   :  { %430 = vmatpush1.bf16.msra.mxu0 %v636_v18  ;;  %461 = vmatprep.mubr.bf16.mxu0 %v778_v44 }
  0x56   :  { %431 = vmatprep.subr.bf16.mxu0 %v641_v20 }
  0x59   :  { %432 = vmatpush1.bf16.msra.mxu0 %v639_v21 }
  0x5a   :  { %433 = vmatprep.subr.bf16.mxu0 %v644_v22 }
  0x5d   :  { %434 = vmatpush1.bf16.msra.mxu0 %v642_v23 }
  0x5e   :  { %435 = vmatprep.subr.bf16.mxu0 %v647_v24 }
  0x61   :  { %436 = vmatpush1.bf16.msra.mxu0 %v645_v25 }
  0x62   :  { %437 = vmatprep.subr.bf16.mxu0 %v650_v26 }
  0x65   :  { %438 = vmatpush1.bf16.msra.mxu0 %v648_v27 }
  0x66   :  { %439 = vmatprep.subr.bf16.mxu0 %v653_v28 }
  0x69   :  { %440 = vmatpush1.bf16.msra.mxu0 %v651_v29 }
  0x6a   :  { %441 = vmatprep.subr.bf16.mxu0 %v656_v40 }
  0x6d   :  { %442 = vmatpush1.bf16.msra.mxu0 %v654_v41 }
  0x6e   :  { %443 = vmatprep.subr.bf16.mxu0 %v659_v42 }
  0x71   :  { %444 = vmatpush1.bf16.msra.mxu0 %v657_v43 }
 0x114   :  { %v196_v31 = vpop.f32.mrf.mxu0 }
 0x115   :  { %v197_v33 = vadd.f32 %v512_v30, %v196_v31 }
 0x116   :  { %v583_v32 = vpop.f32.mrf.mxu0 }
 0x117   :  { %v203_v37 = vmax.f32 %v197_v33, 0.0 }
 0x118   :  { %v199_v34 = vpop.f32.mrf.mxu0 }
 0x119   :  { %v200_v35 = vadd.f32 %v512_v30, %v199_v34 }
 0x11a   :  { %v584_v36 = vpop.f32.mrf.mxu0 }
 0x11b   :  { %v204_v38 = vmax.f32 %v200_v35, 0.0 }
 0x11d   :  { %v205_v39 = vpack.c.bf16 %v204_v38, %v203_v37 }
 0x11f   :  { %602 = vmatmul.mubr.bf16.vlgmr.msra.gmra.mxu1 %v205_v39 }
 0x1df   :  { %v311_v46 = vpop.f32.mrf.mxu1 }
 0x1e0   :  { %v312_v48 = vadd.f32 %v522_v45, %v311_v46 }
 0x1e1   :  { %v603_v47 = vpop.f32.mrf.mxu1 }
 0x1e2   :  { %v318_v52 = vmax.f32 %v312_v48, 0.0 }
 0x1e3   :  { %v314_v49 = vpop.f32.mrf.mxu1 }
 0x1e4   :  { %v315_v50 = vadd.f32 %v522_v45, %v314_v49 }
 0x1e5   :  { %v604_v51 = vpop.f32.mrf.mxu1 }
 0x1e6   :  { %v319_v53 = vmax.f32 %v315_v50, 0.0 }
 0x1e8   :  { %v320_v54 = vpack.c.bf16 %v319_v53, %v318_v52 }
 0x1ea   :  { %462 = vmatmul.mubr.bf16.vlgmr.msra.gmra.mxu0 %v320_v54 }
 0x2aa   :  { %v463_v62 = vpop.f32.mrf.mxu0 }
 0x2ab   :  { %v464_v63 = vadd.f32 %v463_v62, %v342_v60 }
 0x2ac   :  { %v465_v0 = vpop.f32.mrf.mxu0 }
 0x2ad   :  { %489 = vst [vmem:[#allocation10] sm:$0xff] %v464_v63  ;;  %v466_v1 = vadd.f32 %v465_v0, %v346_v61 }
 0x2ae   :  { %v467_v2 = vpop.f32.mrf.mxu0 }
 0x2af   :  { %v476_v3 = vmax.f32 %v466_v1, -20.0  ;;  %v468_v4 = vadd.f32 %v467_v2, %v342_v60 }
 0x2b0   :  { %v469_v5 = vpop.f32.mrf.mxu0 }
 0x2b1   :  { %v480_v6 = vmin.f32 %v476_v3, 2.0  ;;  %491 = vst [vmem:[#allocation10 + $0x10] sm:$0xff] %v468_v4  ;;  %v470_v7 = vadd.f32 %v469_v5, %v346_v61 }
 0x2b3   :  { %490 = vst [vmem:[#allocation10 + $0x8] sm:$0xff] %v480_v6  ;;  %v478_v8 = vmax.f32 %v470_v7, -20.0 }
 0x2b5   :  { %v482_v9 = vmin.f32 %v478_v8, 2.0 }
 0x2b7   :  { %492 = vst [vmem:[#allocation10 + $0x18] sm:$0xff] %v482_v9 }
 0x2b8   :  { %751 = shalt.err (!%p748_p10)
}
 0x2b9   :  { %s780_s27 = smov 256   ;;  %s781_s28 = smov 16  }
 0x2ba   :  { %504 = dma.vmem_to_hbm [thread:$0]  %s499_s26, 512, %s853_s7, [#allocation4], %s780_s27, %s780_s27, %s781_s28  }
 0x2bb   :  { %766 = dma.done.wait [#allocation4], 512  }
 0x2bc   :  { %767 = vsyncadd [#allocation4], 4294966784 }
 0x2bd   :  { %508 = vsyncpa [#allocation3], 1 }
 0x2be   :  { %509 = vsyncpa [#allocation6], 1 }
 0x2bf   :  { %510 = vsyncpa [#allocation9], 1 }
 0x2c0   :  { %511 = vsyncpa [#allocation4], 1 }

</bundles_post_ra>
